<compile_context>
chip_gen: v7x
topology: tpu7x:2x2x1
jax: 0.10.0
libtpu: 0.0.40
codegen_flags: <defaults>
</compile_context>

<pallas_src>
import math

import jax
import jax.numpy as jnp
from jax import lax
from jax.experimental import pallas as pl
from jax.experimental.pallas import tpu as pltpu


def _round_up(n, m):
    return ((n + m - 1) // m) * m


_VMEM_LIMIT = 32 * 1024 * 1024  # safe on v5e/v6e/v7x, above the 16 MiB scoped default


# ----------------------------------------------------------------------------
# Kernel 1: tiled matmul + bias + ReLU (conv realized as im2col + matmul)
# ----------------------------------------------------------------------------
def _matmul_bias_relu_kernel(p_ref, w_ref, b_ref, o_ref):
    y = jnp.dot(p_ref[...], w_ref[...], preferred_element_type=jnp.float32)
    y = y + b_ref[...]
    o_ref[...] = jnp.maximum(y, 0.0).astype(o_ref.dtype)


def conv2d_3x3_s2_relu_nhwc(x, w, b):
    """3x3 / stride-2 / pad-1 conv + ReLU, channels-last in/out.

    x: (B, H, W, C) float; w: (Cout, Cin, 3, 3) torch layout; b: (Cout,)
    returns (B, Ho, Wo, Cout) bfloat16
    """
    B, H, W, C = x.shape
    Cout = w.shape[0]
    Ho = (H + 2 - 3) // 2 + 1
    Wo = (W + 2 - 3) // 2 + 1

    # im2col in bf16 (halves HBM traffic); patch feature index = (kh*3 + kw)*C + c
    # TODO(synk): a tap-loop conv kernel (9 accumulated matmuls over pl.ds-shifted blocks)
    # would avoid materializing the 9x patches tensor in HBM entirely.
    xp = jnp.pad(x.astype(jnp.bfloat16), ((0, 0), (1, 1), (1, 1), (0, 0)))
    cols = [xp[:, di:di + 2 * Ho:2, dj:dj + 2 * Wo:2, :]
            for di in range(3) for dj in range(3)]
    patches = jnp.concatenate(cols, axis=-1).reshape(B * Ho * Wo, 9 * C)

    # weights -> (K, Coutp) with rows in the same (tap, c) order; lane-dense padded N
    K = 9 * C
    Kp = _round_up(K, 16)
    Coutp = _round_up(Cout, 128)
    wmat = jnp.transpose(w, (2, 3, 1, 0)).reshape(K, Cout)
    wmat = jnp.pad(wmat, ((0, Kp - K), (0, Coutp - Cout))).astype(jnp.bfloat16)
    bias = jnp.pad(b, (0, Coutp - Cout)).reshape(1, Coutp).astype(jnp.float32)

    rows = B * Ho * Wo
    tm = 256 if rows >= 256 else _round_up(rows, 8)
    rows_p = _round_up(rows, tm)
    patches = jnp.pad(patches, ((0, rows_p - rows), (0, Kp - K)))

    out = pl.pallas_call(
        _matmul_bias_relu_kernel,
        out_shape=jax.ShapeDtypeStruct((rows_p, Coutp), jnp.bfloat16),
        grid=(rows_p // tm,),
        in_specs=[
            pl.BlockSpec((tm, Kp), lambda i: (i, 0)),
            pl.BlockSpec((Kp, Coutp), lambda i: (0, 0)),
            pl.BlockSpec((1, Coutp), lambda i: (0, 0)),
        ],
        out_specs=pl.BlockSpec((tm, Coutp), lambda i: (i, 0)),
        compiler_params=pltpu.CompilerParams(
            dimension_semantics=("parallel",),
            vmem_limit_bytes=_VMEM_LIMIT),
    )(patches, wmat, bias)

    return out[:rows, :Cout].reshape(B, Ho, Wo, Cout)


# ----------------------------------------------------------------------------
# Kernel 2: SED head  (max/avg pool over segments, fc1+ReLU, AttBlockV2)
#   * flattened (B*Mp, Fpad) layout, BB batches per grid step
#   * pooling via pltpu.roll (XLU) + precomputed edge masks  (O(Mp), not O(Mp^2))
#   * per-batch softmax / attention reductions expressed as segment-matrix matmuls
# ----------------------------------------------------------------------------
def _head_kernel(x_ref, lok_ref, rok_ref, seg_ref, segt_ref,
                 wfc_ref, bfc_ref, watt_ref, batt_ref, wcla_ref, bcla_ref,
                 clip_ref, logit_ref, seglog_ref, segout_ref):
    x = x_ref[...]                                # (RB, Fp) f32, already mean over time
    rb = x.shape[0]

    # --- max_pool1d(k=3,s=1,p=1) + avg_pool1d(k=3,s=1,p=1) over the segment axis ---
    left = pltpu.roll(x, 1, 0)                    # left[r]  = x[r-1]  (wrap masked below)
    right = pltpu.roll(x, rb - 1, 0)              # right[r] = x[r+1]
    lok = lok_ref[...]                            # (RB, 1) 1.0 iff row has a left neighbor
    rok = rok_ref[...]                            # (RB, 1) 1.0 iff row has a right neighbor
    big_neg = jnp.float32(-1e30)                  # stands in for the implicit -inf padding
    left_mx = left * lok + big_neg * (1.0 - lok)
    right_mx = right * rok + big_neg * (1.0 - rok)
    x1 = jnp.maximum(jnp.maximum(left_mx, x), right_mx)
    x2 = (left * lok + x + right * rok) * jnp.float32(1.0 / 3.0)  # count_include_pad -> /3
    xp = x1 + x2                                  # dropout is identity in eval mode

    # --- fc1 + ReLU ---
    h = jnp.dot(xp.astype(jnp.bfloat16), wfc_ref[...],
                preferred_element_type=jnp.float32) + bfc_ref[...]
    h = jnp.maximum(h, 0.0)
    hb = h.astype(jnp.bfloat16)

    # --- AttBlockV2 (1x1 convs over the feature dim) ---
    att_lin = jnp.dot(hb, watt_ref[...], preferred_element_type=jnp.float32) + batt_ref[...]
    cla_lin = jnp.dot(hb, wcla_ref[...], preferred_element_type=jnp.float32) + bcla_ref[...]

    # softmax(tanh(att)) over the segments of each batch; tanh in [-1,1] -> no max-shift
    e = jnp.exp(jnp.tanh(att_lin))                # (RB, Cp)
    seg = seg_ref[...]                            # (RB, BB) one-hot segment matrix
    segt = segt_ref[...]                          # (BB, RB)
    denom = jnp.dot(segt, e, preferred_element_type=jnp.float32)          # (BB, Cp)
    denom_rows = jnp.dot(seg, denom, preferred_element_type=jnp.float32)  # (RB, Cp)
    norm_att = e * pl.reciprocal(denom_rows, approx=True)
    cla = jax.nn.sigmoid(cla_lin)

    clip_ref[...] = jnp.dot(segt, norm_att * cla, preferred_element_type=jnp.float32)
    logit_ref[...] = jnp.dot(segt, norm_att * cla_lin, preferred_element_type=jnp.float32)
    seglog_ref[...] = cla_lin
    segout_ref[...] = cla


def _pick_bb(batch):
    # batches per head grid step: whole batch, or 8-aligned chunks (megacore parallelism)
    for bb in range(batch // 2, 7, -1):
        if batch % bb == 0 and bb % 8 == 0:
            return bb
    return batch


def sed_head(xm, p):
    """xm: (B, Mp, F) f32 time-averaged encoder features (channels last)."""
    B, Mp, F = xm.shape
    C = p["att_w_t"].shape[1]
    Fp = _round_up(F, 128)
    Cp = _round_up(C, 128)
    BB = _pick_bb(B)
    RB = BB * Mp

    x_flat = jnp.pad(xm, ((0, 0), (0, 0), (0, Fp - F))).reshape(B * Mp, Fp)

    # per-block constants (identical for every grid step)
    pos = jnp.tile(jnp.arange(Mp, dtype=jnp.int32), BB)
    left_ok = (pos > 0).astype(jnp.float32).reshape(RB, 1)
    right_ok = (pos < Mp - 1).astype(jnp.float32).reshape(RB, 1)
    seg_id = jnp.arange(RB, dtype=jnp.int32) // Mp
    seg_mat = (seg_id[:, None] == jnp.arange(BB, dtype=jnp.int32)[None, :]).astype(jnp.float32)
    seg_mat_t = seg_mat.T

    pad2 = lambda a, r, c: jnp.pad(a, ((0, r - a.shape[0]), (0, c - a.shape[1])))
    pad1 = lambda a, n: jnp.pad(a, (0, n - a.shape[0]))
    wfc = pad2(p["fc1_w_t"], Fp, Fp).astype(jnp.bfloat16)
    bfc = pad1(p["fc1_b"], Fp).reshape(1, Fp).astype(jnp.float32)
    watt = pad2(p["att_w_t"], Fp, Cp).astype(jnp.bfloat16)
    batt = pad1(p["att_b"], Cp).reshape(1, Cp).astype(jnp.float32)
    wcla = pad2(p["cla_w_t"], Fp, Cp).astype(jnp.bfloat16)
    bcla = pad1(p["cla_b"], Cp).reshape(1, Cp).astype(jnp.float32)

    clip_p, logit_p, seglog_p, segout_p = pl.pallas_call(
        _head_kernel,
        out_shape=(
            jax.ShapeDtypeStruct((B, Cp), jnp.float32),
            jax.ShapeDtypeStruct((B, Cp), jnp.float32),
            jax.ShapeDtypeStruct((B * Mp, Cp), jnp.float32),
            jax.ShapeDtypeStruct((B * Mp, Cp), jnp.float32),
        ),
        grid=(B // BB,),
        in_specs=[
            pl.BlockSpec((RB, Fp), lambda i: (i, 0)),
            pl.BlockSpec((RB, 1), lambda i: (0, 0)),
            pl.BlockSpec((RB, 1), lambda i: (0, 0)),
            pl.BlockSpec((RB, BB), lambda i: (0, 0)),
            pl.BlockSpec((BB, RB), lambda i: (0, 0)),
            pl.BlockSpec((Fp, Fp), lambda i: (0, 0)),
            pl.BlockSpec((1, Fp), lambda i: (0, 0)),
            pl.BlockSpec((Fp, Cp), lambda i: (0, 0)),
            pl.BlockSpec((1, Cp), lambda i: (0, 0)),
            pl.BlockSpec((Fp, Cp), lambda i: (0, 0)),
            pl.BlockSpec((1, Cp), lambda i: (0, 0)),
        ],
        out_specs=[
            pl.BlockSpec((BB, Cp), lambda i: (i, 0)),
            pl.BlockSpec((BB, Cp), lambda i: (i, 0)),
            pl.BlockSpec((RB, Cp), lambda i: (i, 0)),
            pl.BlockSpec((RB, Cp), lambda i: (i, 0)),
        ],
        compiler_params=pltpu.CompilerParams(
            dimension_semantics=("parallel",),
            vmem_limit_bytes=_VMEM_LIMIT),
    )(x_flat, left_ok, right_ok, seg_mat, seg_mat_t,
      wfc, bfc, watt, batt, wcla, bcla)

    clip = clip_p[:, :C]
    logit = logit_p[:, :C]
    seg_logit = seglog_p[:, :C].reshape(B, Mp, C)
    seg_out = segout_p[:, :C].reshape(B, Mp, C)
    return clip, logit, seg_logit, seg_out


# ----------------------------------------------------------------------------
# Post-head glue: interpolate (repeat) + pad_framewise_output (align_corners)
# ----------------------------------------------------------------------------
def interpolate_repeat(x, ratio):
    # (B, T, C) -> (B, T*ratio, C), each frame repeated `ratio` times
    return jnp.repeat(x, ratio, axis=1)


def pad_framewise(fw, frames_num):
    # F.interpolate(..., mode='bilinear', align_corners=True), class dim unchanged
    B, Tin, C = fw.shape
    if Tin == frames_num:
        return fw
    pos = jnp.arange(frames_num, dtype=jnp.float32) * (Tin - 1) / (frames_num - 1)
    lo = jnp.floor(pos).astype(jnp.int32)
    hi = jnp.clip(lo + 1, 0, Tin - 1)
    w = (pos - lo.astype(jnp.float32))[None, :, None]
    return fw[:, lo, :] * (1.0 - w) + fw[:, hi, :] * w


# ----------------------------------------------------------------------------
# Full forward (eval mode)
# ----------------------------------------------------------------------------
def timm_sed_forward(x, p, eps=1e-5):
    B, Cin, T, M = x.shape
    frames_num = T

    # bn0 (BatchNorm2d over the mel axis, eval mode) folded into the XLA fusion that
    # also does the transpose + pad + im2col for conv1 (no standalone memory-bound kernel).
    scale = p["bn0_gamma"] * lax.rsqrt(p["bn0_var"] + eps)
    shift = p["bn0_beta"] - p["bn0_mean"] * scale
    x = x * scale[None, None, None, :] + shift[None, None, None, :]

    # (training-only SpecAugmentation / dropout skipped -- identity in eval)
    # torch: x.transpose(2,3) -> NCHW (B, Cin, M, T); channels-last equivalent (B, M, T, Cin)
    x = jnp.transpose(x, (0, 3, 2, 1))

    # "encoder" stand-in, channels-last throughout
    # TODO(synk): real tf_efficientnet_b0_ns backbone not replicated (external timm weights).
    h = conv2d_3x3_s2_relu_nhwc(x, p["conv1_w"], p["conv1_b"])
    h = conv2d_3x3_s2_relu_nhwc(h, p["conv2_w"], p["conv2_b"])   # (B, Mp, Tp, F) bf16

    # torch.mean(x, dim=3) == mean over the frames-derived axis (axis 2 here)
    xm = jnp.mean(h.astype(jnp.float32), axis=2)                 # (B, Mp, F)

    clipwise_output, logit, seg_logit, seg_out = sed_head(xm, p)

    ratio = frames_num // seg_out.shape[1]
    framewise_output = pad_framewise(interpolate_repeat(seg_out, ratio), frames_num)
    framewise_logit = pad_framewise(interpolate_repeat(seg_logit, ratio), frames_num)

    return {
        "framewise_output": framewise_output,
        "clipwise_output": clipwise_output,
        "logit": logit,
        "framewise_logit": framewise_logit,
    }


# ----------------------------------------------------------------------------
# Deterministic parameter construction
# ----------------------------------------------------------------------------
def make_params(key, c_in, n_mels, f1, f2, num_classes):
    ks = jax.random.split(key, 5)

    def xavier(k, shape, fan_in, fan_out):
        a = math.sqrt(6.0 / (fan_in + fan_out))
        return jax.random.uniform(k, shape, jnp.float32, -a, a)

    return {
        # bn0 (init_bn: weight=1, bias=0; running stats default)
        "bn0_gamma": jnp.ones((n_mels,), jnp.float32),
        "bn0_beta": jnp.zeros((n_mels,), jnp.float32),
        "bn0_mean": jnp.zeros((n_mels,), jnp.float32),
        "bn0_var": jnp.ones((n_mels,), jnp.float32),
        # synthetic encoder convs (torch (Cout, Cin, 3, 3) layout)
        "conv1_w": xavier(ks[0], (f1, c_in, 3, 3), c_in * 9, f1 * 9),
        "conv1_b": jnp.zeros((f1,), jnp.float32),
        "conv2_w": xavier(ks[1], (f2, f1, 3, 3), f1 * 9, f2 * 9),
        "conv2_b": jnp.zeros((f2,), jnp.float32),
        # fc1 (Linear(F, F), xavier, zero bias) stored pre-transposed (in, out)
        "fc1_w_t": xavier(ks[2], (f2, f2), f2, f2),
        "fc1_b": jnp.zeros((f2,), jnp.float32),
        # AttBlockV2: Conv1d(F, C, 1) weights stored pre-transposed (F, C)
        "att_w_t": xavier(ks[3], (f2, num_classes), f2, num_classes),
        "att_b": jnp.zeros((num_classes,), jnp.float32),
        "cla_w_t": xavier(ks[4], (f2, num_classes), f2, num_classes),
        "cla_b": jnp.zeros((num_classes,), jnp.float32),
    }


if __name__ == "__main__":
    B, C_IN, T, N_MELS = 2, 3, 16, 16
    F1, F2, NUM_CLASSES = 32, 64, 8

    key = jax.random.PRNGKey(0)
    k_x, k_p = jax.random.split(key)
    x = jax.random.normal(k_x, (B, C_IN, T, N_MELS), jnp.float32)
    params = make_params(k_p, C_IN, N_MELS, F1, F2, NUM_CLASSES)

    fwd = jax.jit(timm_sed_forward)
    out = fwd(x, params)
    jax.block_until_ready(out)

    assert out["framewise_output"].shape == (B, T, NUM_CLASSES)
    assert out["clipwise_output"].shape == (B, NUM_CLASSES)
    assert out["logit"].shape == (B, NUM_CLASSES)
    assert out["framewise_logit"].shape == (B, T, NUM_CLASSES)
    print("KERNEL_OK")
</pallas_src>

<mosaic_0001>
module attributes {stable_mosaic.version = 11 : i64} {
  func.func @_matmul_bias_relu_kernel(%arg0: i32, %arg1: memref<128x32xbf16, #tpu.memory_space<vmem>>, %arg2: memref<32x128xbf16, #tpu.memory_space<vmem>>, %arg3: memref<1x128xf32, #tpu.memory_space<vmem>>, %arg4: memref<128x128xbf16, #tpu.memory_space<vmem>>) attributes {dimension_semantics = [#tpu.dimension_semantics<parallel>], iteration_bounds = array<i64: 1>, scalar_prefetch = 0 : i64, scratch_operands = 0 : i64, tpu.core_type = #tpu.core_type<tc>, window_params = [{transform_indices = @transform_0, window_bounds = array<i64: 128, 32>}, {pipeline_mode = #tpu.pipeline_mode<synchronous>, transform_indices = @transform_1, window_bounds = array<i64: 32, 128>}, {pipeline_mode = #tpu.pipeline_mode<synchronous>, transform_indices = @transform_2, window_bounds = array<i64: 1, 128>}, {transform_indices = @transform_3, window_bounds = array<i64: 128, 128>}]} {
    %c0 = arith.constant 0 : index
    %c0_0 = arith.constant 0 : index
    %0 = vector.load %arg1[%c0, %c0_0] : memref<128x32xbf16, #tpu.memory_space<vmem>>, vector<128x32xbf16>
    %c0_1 = arith.constant 0 : index
    %c0_2 = arith.constant 0 : index
    %1 = vector.load %arg2[%c0_1, %c0_2] : memref<32x128xbf16, #tpu.memory_space<vmem>>, vector<32x128xbf16>
    %cst = arith.constant dense<0.000000e+00> : vector<128x128xf32>
    %2 = tpu.matmul %0, %1, %cst {dimension_numbers = #tpu.dot_dimension_numbers<[1], [0], [0], [1], [0, 0, 1, 1], [], []>} : vector<128x32xbf16>, vector<32x128xbf16>, vector<128x128xf32> -> vector<128x128xf32>
    %c0_3 = arith.constant 0 : index
    %c0_4 = arith.constant 0 : index
    %3 = vector.load %arg3[%c0_3, %c0_4] : memref<1x128xf32, #tpu.memory_space<vmem>>, vector<1x128xf32>
    %4 = vector.broadcast %3 : vector<1x128xf32> to vector<128x128xf32>
    %5 = arith.addf %2, %4 : vector<128x128xf32>
    %cst_5 = arith.constant 0.000000e+00 : f32
    %6 = vector.broadcast %cst_5 : f32 to vector<128x128xf32>
    %7 = arith.maximumf %5, %6 : vector<128x128xf32>
    %8 = arith.truncf %7 : vector<128x128xf32> to vector<128x128xbf16>
    %c0_6 = arith.constant 0 : index
    %c0_7 = arith.constant 0 : index
    %9 = vector.load %arg4[%c0_6, %c0_7] : memref<128x128xbf16, #tpu.memory_space<vmem>>, vector<128x128xbf16>
    tpu.vector_store %arg4[%c0_6, %c0_7], %8 {strides = array<i32>} : memref<128x128xbf16, #tpu.memory_space<vmem>>, vector<128x128xbf16>,
    return
  }
  func.func @transform_0(%arg0: i32) -> (i32, i32) {
    %c0_i32 = arith.constant 0 : i32
    %c0_i32_0 = arith.constant 0 : i32
    return %arg0, %c0_i32 : i32, i32
  }
  func.func @transform_1(%arg0: i32) -> (i32, i32) {
    %c0_i32 = arith.constant 0 : i32
    %c0_i32_0 = arith.constant 0 : i32
    %c0_i32_1 = arith.constant 0 : i32
    return %c0_i32, %c0_i32_0 : i32, i32
  }
  func.func @transform_2(%arg0: i32) -> (i32, i32) {
    %c0_i32 = arith.constant 0 : i32
    %c0_i32_0 = arith.constant 0 : i32
    %c0_i32_1 = arith.constant 0 : i32
    return %c0_i32, %c0_i32_0 : i32, i32
  }
  func.func @transform_3(%arg0: i32) -> (i32, i32) {
    %c0_i32 = arith.constant 0 : i32
    %c0_i32_0 = arith.constant 0 : i32
    return %arg0, %c0_i32 : i32, i32
  }
}

module attributes {stable_mosaic.version = 11 : i64} {
  func.func @_matmul_bias_relu_kernel(%arg0: i32, %arg1: memref<32x288xbf16, #tpu.memory_space<vmem>>, %arg2: memref<288x128xbf16, #tpu.memory_space<vmem>>, %arg3: memref<1x128xf32, #tpu.memory_space<vmem>>, %arg4: memref<32x128xbf16, #tpu.memory_space<vmem>>) attributes {dimension_semantics = [#tpu.dimension_semantics<parallel>], iteration_bounds = array<i64: 1>, scalar_prefetch = 0 : i64, scratch_operands = 0 : i64, tpu.core_type = #tpu.core_type<tc>, window_params = [{transform_indices = @transform_0, window_bounds = array<i64: 32, 288>}, {pipeline_mode = #tpu.pipeline_mode<synchronous>, transform_indices = @transform_1, window_bounds = array<i64: 288, 128>}, {pipeline_mode = #tpu.pipeline_mode<synchronous>, transform_indices = @transform_2, window_bounds = array<i64: 1, 128>}, {transform_indices = @transform_3, window_bounds = array<i64: 32, 128>}]} {
    %c0 = arith.constant 0 : index
    %c0_0 = arith.constant 0 : index
    %0 = vector.load %arg1[%c0, %c0_0] : memref<32x288xbf16, #tpu.memory_space<vmem>>, vector<32x288xbf16>
    %c0_1 = arith.constant 0 : index
    %c0_2 = arith.constant 0 : index
    %1 = vector.load %arg2[%c0_1, %c0_2] : memref<288x128xbf16, #tpu.memory_space<vmem>>, vector<288x128xbf16>
    %cst = arith.constant dense<0.000000e+00> : vector<32x128xf32>
    %2 = tpu.matmul %0, %1, %cst {dimension_numbers = #tpu.dot_dimension_numbers<[1], [0], [0], [1], [0, 0, 1, 1], [], []>} : vector<32x288xbf16>, vector<288x128xbf16>, vector<32x128xf32> -> vector<32x128xf32>
    %c0_3 = arith.constant 0 : index
    %c0_4 = arith.constant 0 : index
    %3 = vector.load %arg3[%c0_3, %c0_4] : memref<1x128xf32, #tpu.memory_space<vmem>>, vector<1x128xf32>
    %4 = vector.broadcast %3 : vector<1x128xf32> to vector<32x128xf32>
    %5 = arith.addf %2, %4 : vector<32x128xf32>
    %cst_5 = arith.constant 0.000000e+00 : f32
    %6 = vector.broadcast %cst_5 : f32 to vector<32x128xf32>
    %7 = arith.maximumf %5, %6 : vector<32x128xf32>
    %8 = arith.truncf %7 : vector<32x128xf32> to vector<32x128xbf16>
    %c0_6 = arith.constant 0 : index
    %c0_7 = arith.constant 0 : index
    %9 = vector.load %arg4[%c0_6, %c0_7] : memref<32x128xbf16, #tpu.memory_space<vmem>>, vector<32x128xbf16>
    tpu.vector_store %arg4[%c0_6, %c0_7], %8 {strides = array<i32>} : memref<32x128xbf16, #tpu.memory_space<vmem>>, vector<32x128xbf16>,
    return
  }
  func.func @transform_0(%arg0: i32) -> (i32, i32) {
    %c0_i32 = arith.constant 0 : i32
    %c0_i32_0 = arith.constant 0 : i32
    return %arg0, %c0_i32 : i32, i32
  }
  func.func @transform_1(%arg0: i32) -> (i32, i32) {
    %c0_i32 = arith.constant 0 : i32
    %c0_i32_0 = arith.constant 0 : i32
    %c0_i32_1 = arith.constant 0 : i32
    return %c0_i32, %c0_i32_0 : i32, i32
  }
  func.func @transform_2(%arg0: i32) -> (i32, i32) {
    %c0_i32 = arith.constant 0 : i32
    %c0_i32_0 = arith.constant 0 : i32
    %c0_i32_1 = arith.constant 0 : i32
    return %c0_i32, %c0_i32_0 : i32, i32
  }
  func.func @transform_3(%arg0: i32) -> (i32, i32) {
    %c0_i32 = arith.constant 0 : i32
    %c0_i32_0 = arith.constant 0 : i32
    return %arg0, %c0_i32 : i32, i32
  }
}

module attributes {stable_mosaic.version = 11 : i64} {
  func.func @_head_kernel(%arg0: i32, %arg1: memref<8x128xf32, #tpu.memory_space<vmem>>, %arg2: memref<8x1xf32, #tpu.memory_space<vmem>>, %arg3: memref<8x1xf32, #tpu.memory_space<vmem>>, %arg4: memref<8x2xf32, #tpu.memory_space<vmem>>, %arg5: memref<2x8xf32, #tpu.memory_space<vmem>>, %arg6: memref<128x128xbf16, #tpu.memory_space<vmem>>, %arg7: memref<1x128xf32, #tpu.memory_space<vmem>>, %arg8: memref<128x128xbf16, #tpu.memory_space<vmem>>, %arg9: memref<1x128xf32, #tpu.memory_space<vmem>>, %arg10: memref<128x128xbf16, #tpu.memory_space<vmem>>, %arg11: memref<1x128xf32, #tpu.memory_space<vmem>>, %arg12: memref<2x128xf32, #tpu.memory_space<vmem>>, %arg13: memref<2x128xf32, #tpu.memory_space<vmem>>, %arg14: memref<8x128xf32, #tpu.memory_space<vmem>>, %arg15: memref<8x128xf32, #tpu.memory_space<vmem>>) attributes {dimension_semantics = [#tpu.dimension_semantics<parallel>], iteration_bounds = array<i64: 1>, scalar_prefetch = 0 : i64, scratch_operands = 0 : i64, tpu.core_type = #tpu.core_type<tc>, window_params = [{transform_indices = @transform_0, window_bounds = array<i64: 8, 128>}, {pipeline_mode = #tpu.pipeline_mode<synchronous>, transform_indices = @transform_1, window_bounds = array<i64: 8, 1>}, {pipeline_mode = #tpu.pipeline_mode<synchronous>, transform_indices = @transform_2, window_bounds = array<i64: 8, 1>}, {pipeline_mode = #tpu.pipeline_mode<synchronous>, transform_indices = @transform_3, window_bounds = array<i64: 8, 2>}, {pipeline_mode = #tpu.pipeline_mode<synchronous>, transform_indices = @transform_4, window_bounds = array<i64: 2, 8>}, {pipeline_mode = #tpu.pipeline_mode<synchronous>, transform_indices = @transform_5, window_bounds = array<i64: 128, 128>}, {pipeline_mode = #tpu.pipeline_mode<synchronous>, transform_indices = @transform_6, window_bounds = array<i64: 1, 128>}, {pipeline_mode = #tpu.pipeline_mode<synchronous>, transform_indices = @transform_7, window_bounds = array<i64: 128, 128>}, {pipeline_mode = #tpu.pipeline_mode<synchronous>, transform_indices = @transform_8, window_bounds = array<i64: 1, 128>}, {pipeline_mode = #tpu.pipeline_mode<synchronous>, transform_indices = @transform_9, window_bounds = array<i64: 128, 128>}, {pipeline_mode = #tpu.pipeline_mode<synchronous>, transform_indices = @transform_10, window_bounds = array<i64: 1, 128>}, {transform_indices = @transform_11, window_bounds = array<i64: 2, 128>}, {transform_indices = @transform_12, window_bounds = array<i64: 2, 128>}, {transform_indices = @transform_13, window_bounds = array<i64: 8, 128>}, {transform_indices = @transform_14, window_bounds = array<i64: 8, 128>}]} {
    %c0 = arith.constant 0 : index
    %c0_0 = arith.constant 0 : index
    %0 = vector.load %arg1[%c0, %c0_0] : memref<8x128xf32, #tpu.memory_space<vmem>>, vector<8x128xf32>
    %c1_i32 = arith.constant 1 : i32
    %1 = tpu.dynamic_rotate %0 by %c1_i32 dim 0 : vector<8x128xf32>, i32 -> vector<8x128xf32>
    %c7_i32 = arith.constant 7 : i32
    %2 = tpu.dynamic_rotate %0 by %c7_i32 dim 0 : vector<8x128xf32>, i32 -> vector<8x128xf32>
    %c0_1 = arith.constant 0 : index
    %c0_2 = arith.constant 0 : index
    %3 = vector.load %arg2[%c0_1, %c0_2] : memref<8x1xf32, #tpu.memory_space<vmem>>, vector<8x1xf32>
    %c0_3 = arith.constant 0 : index
    %c0_4 = arith.constant 0 : index
    %4 = vector.load %arg3[%c0_3, %c0_4] : memref<8x1xf32, #tpu.memory_space<vmem>>, vector<8x1xf32>
    %5 = vector.broadcast %3 : vector<8x1xf32> to vector<8x128xf32>
    %6 = arith.mulf %1, %5 : vector<8x128xf32>
    %cst = arith.constant 1.000000e+00 : f32
    %7 = vector.broadcast %cst : f32 to vector<8x1xf32>
    %8 = arith.subf %7, %3 : vector<8x1xf32>
    %cst_5 = arith.constant -1.000000e+30 : f32
    %9 = vector.broadcast %cst_5 : f32 to vector<8x1xf32>
    %10 = arith.mulf %9, %8 : vector<8x1xf32>
    %11 = vector.broadcast %10 : vector<8x1xf32> to vector<8x128xf32>
    %12 = arith.addf %6, %11 : vector<8x128xf32>
    %13 = vector.broadcast %4 : vector<8x1xf32> to vector<8x128xf32>
    %14 = arith.mulf %2, %13 : vector<8x128xf32>
    %cst_6 = arith.constant 1.000000e+00 : f32
    %15 = vector.broadcast %cst_6 : f32 to vector<8x1xf32>
    %16 = arith.subf %15, %4 : vector<8x1xf32>
    %cst_7 = arith.constant -1.000000e+30 : f32
    %17 = vector.broadcast %cst_7 : f32 to vector<8x1xf32>
    %18 = arith.mulf %17, %16 : vector<8x1xf32>
    %19 = vector.broadcast %18 : vector<8x1xf32> to vector<8x128xf32>
    %20 = arith.addf %14, %19 : vector<8x128xf32>
    %21 = arith.maximumf %12, %0 : vector<8x128xf32>
    %22 = arith.maximumf %21, %20 : vector<8x128xf32>
    %23 = vector.broadcast %3 : vector<8x1xf32> to vector<8x128xf32>
    %24 = arith.mulf %1, %23 : vector<8x128xf32>
    %25 = arith.addf %24, %0 : vector<8x128xf32>
    %26 = vector.broadcast %4 : vector<8x1xf32> to vector<8x128xf32>
    %27 = arith.mulf %2, %26 : vector<8x128xf32>
    %28 = arith.addf %25, %27 : vector<8x128xf32>
    %cst_8 = arith.constant 0.333333343 : f32
    %29 = vector.broadcast %cst_8 : f32 to vector<8x128xf32>
    %30 = arith.mulf %28, %29 : vector<8x128xf32>
    %31 = arith.addf %22, %30 : vector<8x128xf32>
    %32 = arith.truncf %31 : vector<8x128xf32> to vector<8x128xbf16>
    %c0_9 = arith.constant 0 : index
    %c0_10 = arith.constant 0 : index
    %33 = vector.load %arg6[%c0_9, %c0_10] : memref<128x128xbf16, #tpu.memory_space<vmem>>, vector<128x128xbf16>
    %cst_11 = arith.constant dense<0.000000e+00> : vector<8x128xf32>
    %34 = tpu.matmul %32, %33, %cst_11 {dimension_numbers = #tpu.dot_dimension_numbers<[1], [0], [0], [1], [0, 0, 1, 1], [], []>} : vector<8x128xbf16>, vector<128x128xbf16>, vector<8x128xf32> -> vector<8x128xf32>
    %c0_12 = arith.constant 0 : index
    %c0_13 = arith.constant 0 : index
    %35 = vector.load %arg7[%c0_12, %c0_13] : memref<1x128xf32, #tpu.memory_space<vmem>>, vector<1x128xf32>
    %36 = vector.broadcast %35 : vector<1x128xf32> to vector<8x128xf32>
    %37 = arith.addf %34, %36 : vector<8x128xf32>
    %cst_14 = arith.constant 0.000000e+00 : f32
    %38 = vector.broadcast %cst_14 : f32 to vector<8x128xf32>
    %39 = arith.maximumf %37, %38 : vector<8x128xf32>
    %40 = arith.truncf %39 : vector<8x128xf32> to vector<8x128xbf16>
    %c0_15 = arith.constant 0 : index
    %c0_16 = arith.constant 0 : index
    %41 = vector.load %arg8[%c0_15, %c0_16] : memref<128x128xbf16, #tpu.memory_space<vmem>>, vector<128x128xbf16>
    %cst_17 = arith.constant dense<0.000000e+00> : vector<8x128xf32>
    %42 = tpu.matmul %40, %41, %cst_17 {dimension_numbers = #tpu.dot_dimension_numbers<[1], [0], [0], [1], [0, 0, 1, 1], [], []>} : vector<8x128xbf16>, vector<128x128xbf16>, vector<8x128xf32> -> vector<8x128xf32>
    %c0_18 = arith.constant 0 : index
    %c0_19 = arith.constant 0 : index
    %43 = vector.load %arg9[%c0_18, %c0_19] : memref<1x128xf32, #tpu.memory_space<vmem>>, vector<1x128xf32>
    %44 = vector.broadcast %43 : vector<1x128xf32> to vector<8x128xf32>
    %45 = arith.addf %42, %44 : vector<8x128xf32>
    %c0_20 = arith.constant 0 : index
    %c0_21 = arith.constant 0 : index
    %46 = vector.load %arg10[%c0_20, %c0_21] : memref<128x128xbf16, #tpu.memory_space<vmem>>, vector<128x128xbf16>
    %cst_22 = arith.constant dense<0.000000e+00> : vector<8x128xf32>
    %47 = tpu.matmul %40, %46, %cst_22 {dimension_numbers = #tpu.dot_dimension_numbers<[1], [0], [0], [1], [0, 0, 1, 1], [], []>} : vector<8x128xbf16>, vector<128x128xbf16>, vector<8x128xf32> -> vector<8x128xf32>
    %c0_23 = arith.constant 0 : index
    %c0_24 = arith.constant 0 : index
    %48 = vector.load %arg11[%c0_23, %c0_24] : memref<1x128xf32, #tpu.memory_space<vmem>>, vector<1x128xf32>
    %49 = vector.broadcast %48 : vector<1x128xf32> to vector<8x128xf32>
    %50 = arith.addf %47, %49 : vector<8x128xf32>
    %51 = math.tanh %45 : vector<8x128xf32>
    %52 = math.exp %51 : vector<8x128xf32>
    %c0_25 = arith.constant 0 : index
    %c0_26 = arith.constant 0 : index
    %53 = vector.load %arg4[%c0_25, %c0_26] : memref<8x2xf32, #tpu.memory_space<vmem>>, vector<8x2xf32>
    %c0_27 = arith.constant 0 : index
    %c0_28 = arith.constant 0 : index
    %54 = vector.load %arg5[%c0_27, %c0_28] : memref<2x8xf32, #tpu.memory_space<vmem>>, vector<2x8xf32>
    %cst_29 = arith.constant dense<0.000000e+00> : vector<2x128xf32>
    %55 = tpu.matmul %54, %52, %cst_29 {dimension_numbers = #tpu.dot_dimension_numbers<[1], [0], [0], [1], [0, 0, 1, 1], [], []>} : vector<2x8xf32>, vector<8x128xf32>, vector<2x128xf32> -> vector<2x128xf32>
    %cst_30 = arith.constant dense<0.000000e+00> : vector<8x128xf32>
    %56 = tpu.matmul %53, %55, %cst_30 {dimension_numbers = #tpu.dot_dimension_numbers<[1], [0], [0], [1], [0, 0, 1, 1], [], []>} : vector<8x2xf32>, vector<2x128xf32>, vector<8x128xf32> -> vector<8x128xf32>
    %57 = tpu.reciprocal %56 {approx = true} : vector<8x128xf32> -> vector<8x128xf32>
    %58 = arith.mulf %52, %57 : vector<8x128xf32>
    %59 = arith.negf %50 : vector<8x128xf32>
    %60 = math.exp %59 : vector<8x128xf32>
    %cst_31 = arith.constant 1.000000e+00 : f32
    %61 = vector.broadcast %cst_31 : f32 to vector<8x128xf32>
    %62 = arith.addf %61, %60 : vector<8x128xf32>
    %63 = arith.divf %61, %62 : vector<8x128xf32>
    %64 = arith.mulf %58, %63 : vector<8x128xf32>
    %cst_32 = arith.constant dense<0.000000e+00> : vector<2x128xf32>
    %65 = tpu.matmul %54, %64, %cst_32 {dimension_numbers = #tpu.dot_dimension_numbers<[1], [0], [0], [1], [0, 0, 1, 1], [], []>} : vector<2x8xf32>, vector<8x128xf32>, vector<2x128xf32> -> vector<2x128xf32>
    %c0_33 = arith.constant 0 : index
    %c0_34 = arith.constant 0 : index
    %66 = vector.load %arg12[%c0_33, %c0_34] : memref<2x128xf32, #tpu.memory_space<vmem>>, vector<2x128xf32>
    tpu.vector_store %arg12[%c0_33, %c0_34], %65 {strides = array<i32>} : memref<2x128xf32, #tpu.memory_space<vmem>>, vector<2x128xf32>,
    %67 = arith.mulf %58, %50 : vector<8x128xf32>
    %cst_35 = arith.constant dense<0.000000e+00> : vector<2x128xf32>
    %68 = tpu.matmul %54, %67, %cst_35 {dimension_numbers = #tpu.dot_dimension_numbers<[1], [0], [0], [1], [0, 0, 1, 1], [], []>} : vector<2x8xf32>, vector<8x128xf32>, vector<2x128xf32> -> vector<2x128xf32>
    %c0_36 = arith.constant 0 : index
    %c0_37 = arith.constant 0 : index
    %69 = vector.load %arg13[%c0_36, %c0_37] : memref<2x128xf32, #tpu.memory_space<vmem>>, vector<2x128xf32>
    tpu.vector_store %arg13[%c0_36, %c0_37], %68 {strides = array<i32>} : memref<2x128xf32, #tpu.memory_space<vmem>>, vector<2x128xf32>,
    %c0_38 = arith.constant 0 : index
    %c0_39 = arith.constant 0 : index
    %70 = vector.load %arg14[%c0_38, %c0_39] : memref<8x128xf32, #tpu.memory_space<vmem>>, vector<8x128xf32>
    tpu.vector_store %arg14[%c0_38, %c0_39], %50 {strides = array<i32>} : memref<8x128xf32, #tpu.memory_space<vmem>>, vector<8x128xf32>,
    %c0_40 = arith.constant 0 : index
    %c0_41 = arith.constant 0 : index
    %71 = vector.load %arg15[%c0_40, %c0_41] : memref<8x128xf32, #tpu.memory_space<vmem>>, vector<8x128xf32>
    tpu.vector_store %arg15[%c0_40, %c0_41], %63 {strides = array<i32>} : memref<8x128xf32, #tpu.memory_space<vmem>>, vector<8x128xf32>,
    return
  }
  func.func @transform_0(%arg0: i32) -> (i32, i32) {
    %c0_i32 = arith.constant 0 : i32
    %c0_i32_0 = arith.constant 0 : i32
    return %arg0, %c0_i32 : i32, i32
  }
  func.func @transform_1(%arg0: i32) -> (i32, i32) {
    %c0_i32 = arith.constant 0 : i32
    %c0_i32_0 = arith.constant 0 : i32
    %c0_i32_1 = arith.constant 0 : i32
    return %c0_i32, %c0_i32_0 : i32, i32
  }
  func.func @transform_2(%arg0: i32) -> (i32, i32) {
    %c0_i32 = arith.constant 0 : i32
    %c0_i32_0 = arith.constant 0 : i32
    %c0_i32_1 = arith.constant 0 : i32
    return %c0_i32, %c0_i32_0 : i32, i32
  }
  func.func @transform_3(%arg0: i32) -> (i32, i32) {
    %c0_i32 = arith.constant 0 : i32
    %c0_i32_0 = arith.constant 0 : i32
    %c0_i32_1 = arith.constant 0 : i32
    return %c0_i32, %c0_i32_0 : i32, i32
  }
  func.func @transform_4(%arg0: i32) -> (i32, i32) {
    %c0_i32 = arith.constant 0 : i32
    %c0_i32_0 = arith.constant 0 : i32
    %c0_i32_1 = arith.constant 0 : i32
    return %c0_i32, %c0_i32_0 : i32, i32
  }
  func.func @transform_5(%arg0: i32) -> (i32, i32) {
    %c0_i32 = arith.constant 0 : i32
    %c0_i32_0 = arith.constant 0 : i32
    %c0_i32_1 = arith.constant 0 : i32
    return %c0_i32, %c0_i32_0 : i32, i32
  }
  func.func @transform_6(%arg0: i32) -> (i32, i32) {
    %c0_i32 = arith.constant 0 : i32
    %c0_i32_0 = arith.constant 0 : i32
    %c0_i32_1 = arith.constant 0 : i32
    return %c0_i32, %c0_i32_0 : i32, i32
  }
  func.func @transform_7(%arg0: i32) -> (i32, i32) {
    %c0_i32 = arith.constant 0 : i32
    %c0_i32_0 = arith.constant 0 : i32
    %c0_i32_1 = arith.constant 0 : i32
    return %c0_i32, %c0_i32_0 : i32, i32
  }
  func.func @transform_8(%arg0: i32) -> (i32, i32) {
    %c0_i32 = arith.constant 0 : i32
    %c0_i32_0 = arith.constant 0 : i32
    %c0_i32_1 = arith.constant 0 : i32
    return %c0_i32, %c0_i32_0 : i32, i32
  }
  func.func @transform_9(%arg0: i32) -> (i32, i32) {
    %c0_i32 = arith.constant 0 : i32
    %c0_i32_0 = arith.constant 0 : i32
    %c0_i32_1 = arith.constant 0 : i32
    return %c0_i32, %c0_i32_0 : i32, i32
  }
  func.func @transform_10(%arg0: i32) -> (i32, i32) {
    %c0_i32 = arith.constant 0 : i32
    %c0_i32_0 = arith.constant 0 : i32
    %c0_i32_1 = arith.constant 0 : i32
    return %c0_i32, %c0_i32_0 : i32, i32
  }
  func.func @transform_11(%arg0: i32) -> (i32, i32) {
    %c0_i32 = arith.constant 0 : i32
    %c0_i32_0 = arith.constant 0 : i32
    return %arg0, %c0_i32 : i32, i32
  }
  func.func @transform_12(%arg0: i32) -> (i32, i32) {
    %c0_i32 = arith.constant 0 : i32
    %c0_i32_0 = arith.constant 0 : i32
    return %arg0, %c0_i32 : i32, i32
  }
  func.func @transform_13(%arg0: i32) -> (i32, i32) {
    %c0_i32 = arith.constant 0 : i32
    %c0_i32_0 = arith.constant 0 : i32
    return %arg0, %c0_i32 : i32, i32
  }
  func.func @transform_14(%arg0: i32) -> (i32, i32) {
    %c0_i32 = arith.constant 0 : i32
    %c0_i32_0 = arith.constant 0 : i32
    return %arg0, %c0_i32 : i32, i32
  }
}

</mosaic_0001>

<bundles_post_ra>
// kernel: timm_sed_forward.3
= control target key start
LH: loop header
LB: loop body
LE: loop exit
PB: predicated region body
PF: predicated region fallthrough
CT: control target
= control target key end

     0   :  { %vm94_vm0 = vcmask 261120   ;;  %s543_s1 = inlined_call_operand.vmem [shape: bf16[32,128], index: 1, kind: input, shape index: {}]   ;;  %s544_s0 = inlined_call_operand.vmem [shape: bf16[128,32], index: 0, kind: input, shape index: {}]   ;;  %s545_s2 = inlined_call_operand.vmem [shape: f32[1,128], index: 2, kind: input, shape index: {}]   ;;  %s546_s3 = inlined_call_operand.vmem [shape: bf16[128,128], index: 3, kind: output, shape index: {}]  }
   0x1   :  { %v448_v0 = vld [vmem:[%s543_s1] sm:$0xff]   ;;  %v449_v1 = vld [vmem:[%s543_s1 + $0x8] sm:$0xff]   ;;  %v454_v6 = vld [vmem:[%s544_s0 + $0x10] sm:$0xff]  }
   0x2   :  { %424 = vmatprep.subr.bf16.mxu0 %v448_v0  ;;  %444 = vmatprep.subr.bf16.mxu1 %v448_v0  ;;  %v450_v2 = vld [vmem:[%s544_s0] sm:$0xff]   ;;  %v452_v4 = vld [vmem:[%s544_s0 + $0x8] sm:$0xff]   ;;  %v455_v7 = vld [vmem:[%s544_s0 + $0x30] sm:$0xff]  }
   0x3   :  { %425 = vmatpush3.bf16.msra.mxu0 %v448_v0  ;;  %446 = vmatpush3.bf16.msra.mxu1 %v448_v0  ;;  %v451_v3 = vld [vmem:[%s544_s0 + $0x20] sm:$0xff]   ;;  %v453_v5 = vld [vmem:[%s544_s0 + $0x28] sm:$0xff]   ;;  %v456_v8 = vld [vmem:[%s544_s0 + $0x18] sm:$0xff]  }
   0x4   :  { %426 = vmatprep.subr.bf16.mxu0 %v449_v1  ;;  %445 = vmatprep.subr.bf16.mxu1 %v449_v1  ;;  %v457_v9 = vld [vmem:[%s544_s0 + $0x38] sm:$0xff]   ;;  %v316_v10 = vld [vmem:[%s545_s2] ss:$0 sm:$0xff] }
   0x5   :  { %428 = vmatprep.mubr.msk.bf16.mxu0 %vm94_vm0, %v450_v2  ;;  %436 = vmatprep.mubr.msk.bf16.mxu1 %vm94_vm0, %v451_v3 }
   0x7   :  { %427 = vmatpush3.bf16.msra.mxu0 %v449_v1  ;;  %447 = vmatpush3.bf16.msra.mxu1 %v449_v1 }
   0xa   :  { %429 = vmatmul.mubr.msk.bf16.vlgmr.msra.gmra.mrb[0].mxu0 %vm94_vm0, %v452_v4  ;;  %437 = vmatmul.mubr.msk.bf16.vlgmr.msra.gmra.mrb[0].mxu1 %vm94_vm0, %v453_v5 }
   0xb   :  { %432 = vmatprep.mubr.msk.bf16.mxu0 %vm94_vm0, %v454_v6  ;;  %440 = vmatprep.mubr.msk.bf16.mxu1 %vm94_vm0, %v455_v7 }
  0x12   :  { %433 = vmatmul.mubr.msk.bf16.gmra.mrb[4].mxu0 %vm94_vm0, %v456_v8  ;;  %441 = vmatmul.mubr.msk.bf16.gmra.mrb[4].mxu1 %vm94_vm0, %v457_v9 }
  0xdd   :  { %v430_v11 = vpop.f32.mrb[0].mxu0  ;;  %v438_v12 = vpop.f32.mrb[0].mxu1 }
  0xde   :  { %v162_v13 = vadd.f32 %v430_v11, %v316_v10  ;;  %v194_v14 = vadd.f32 %v438_v12, %v316_v10  ;;  %v153_v15 = vpop.f32.mrb[1].mxu0  ;;  %v185_v16 = vpop.f32.mrb[1].mxu1 }
  0xdf   :  { %v154_v17 = vadd.f32 %v316_v10, %v153_v15  ;;  %v186_v18 = vadd.f32 %v316_v10, %v185_v16  ;;  %v431_v19 = vpop.f32.mrb[2].mxu0  ;;  %v439_v20 = vpop.f32.mrb[2].mxu1 }
  0xe0   :  { %v165_v21 = vadd.f32 %v431_v19, %v316_v10  ;;  %v197_v22 = vadd.f32 %v439_v20, %v316_v10  ;;  %v156_v23 = vpop.f32.mrb[3].mxu0  ;;  %v188_v24 = vpop.f32.mrb[3].mxu1  ;;  %v218_v27 = vmax.f32 %v162_v13, 0.0  ;;  %v226_v28 = vmax.f32 %v194_v14, 0.0 }
  0xe1   :  { %v157_v25 = vadd.f32 %v316_v10, %v156_v23  ;;  %v189_v26 = vadd.f32 %v316_v10, %v188_v24  ;;  %v216_v31 = vmax.f32 %v154_v17, 0.0  ;;  %v224_v32 = vmax.f32 %v186_v18, 0.0 }
  0xe2   :  { %v219_v29 = vmax.f32 %v165_v21, 0.0  ;;  %v227_v30 = vmax.f32 %v197_v22, 0.0 }
  0xe3   :  { %v217_v33 = vmax.f32 %v157_v25, 0.0  ;;  %v225_v34 = vmax.f32 %v189_v26, 0.0 }
  0xe4   :  { %v375_v35 = vpack.c.bf16 %v219_v29, %v218_v27  ;;  %v395_v36 = vpack.c.bf16 %v227_v30, %v226_v28 }
  0xe5   :  { %v370_v37 = vpack.c.bf16 %v217_v33, %v216_v31  ;;  %v390_v38 = vpack.c.bf16 %v225_v34, %v224_v32  ;;  %v434_v39 = vpop.f32.mrb[4].mxu0  ;;  %v442_v40 = vpop.f32.mrb[4].mxu1 }
  0xe6   :  { %407 = vst [vmem:[%s546_s3 + $0x8] sm:$0xff] %v375_v35   ;;  %411 = vst [vmem:[%s546_s3 + $0x28] sm:$0xff] %v395_v36   ;;  %v178_v41 = vadd.f32 %v434_v39, %v316_v10  ;;  %v210_v42 = vadd.f32 %v442_v40, %v316_v10  ;;  %v169_v43 = vpop.f32.mrb[5].mxu0  ;;  %v201_v44 = vpop.f32.mrb[5].mxu1 }
  0xe7   :  { %371 = vst [vmem:[%s546_s3] sm:$0xff] %v370_v37   ;;  %410 = vst [vmem:[%s546_s3 + $0x20] sm:$0xff] %v390_v38   ;;  %v170_v45 = vadd.f32 %v316_v10, %v169_v43  ;;  %v202_v46 = vadd.f32 %v316_v10, %v201_v44  ;;  %v435_v47 = vpop.f32.mrb[6].mxu0  ;;  %v443_v48 = vpop.f32.mrb[6].mxu1 }
  0xe8   :  { %v181_v49 = vadd.f32 %v435_v47, %v316_v10  ;;  %v213_v50 = vadd.f32 %v443_v48, %v316_v10  ;;  %v172_v51 = vpop.f32.mrb[7].mxu0  ;;  %v204_v52 = vpop.f32.mrb[7].mxu1  ;;  %v222_v55 = vmax.f32 %v178_v41, 0.0  ;;  %v230_v56 = vmax.f32 %v210_v42, 0.0 }
  0xe9   :  { %v173_v53 = vadd.f32 %v316_v10, %v172_v51  ;;  %v205_v54 = vadd.f32 %v316_v10, %v204_v52  ;;  %v220_v59 = vmax.f32 %v170_v45, 0.0  ;;  %v228_v60 = vmax.f32 %v202_v46, 0.0 }
  0xea   :  { %v223_v57 = vmax.f32 %v181_v49, 0.0  ;;  %v231_v58 = vmax.f32 %v213_v50, 0.0 }
  0xeb   :  { %v221_v61 = vmax.f32 %v173_v53, 0.0  ;;  %v229_v62 = vmax.f32 %v205_v54, 0.0 }
  0xec   :  { %v385_v63 = vpack.c.bf16 %v223_v57, %v222_v55  ;;  %v405_v0 = vpack.c.bf16 %v231_v58, %v230_v56 }
  0xed   :  { %v380_v1 = vpack.c.bf16 %v221_v61, %v220_v59  ;;  %v400_v2 = vpack.c.bf16 %v229_v62, %v228_v60 }
  0xee   :  { %409 = vst [vmem:[%s546_s3 + $0x18] sm:$0xff] %v385_v63   ;;  %413 = vst [vmem:[%s546_s3 + $0x38] sm:$0xff] %v405_v0  }
  0xef   :  { %408 = vst [vmem:[%s546_s3 + $0x10] sm:$0xff] %v380_v1   ;;  %412 = vst [vmem:[%s546_s3 + $0x30] sm:$0xff] %v400_v2  }

// kernel: timm_sed_forward.4
= control target key start
LH: loop header
LB: loop body
LE: loop exit
PB: predicated region body
PF: predicated region fallthrough
CT: control target
= control target key end

     0   :  { %vm204_vm0 = vcmask 261120   ;;  %s550_s1 = inlined_call_operand.vmem [shape: bf16[288,128], index: 1, kind: input, shape index: {}]   ;;  %s551_s0 = inlined_call_operand.vmem [shape: bf16[32,288], index: 0, kind: input, shape index: {}]   ;;  %s552_s2 = inlined_call_operand.vmem [shape: f32[1,128], index: 2, kind: input, shape index: {}]   ;;  %s553_s3 = inlined_call_operand.vmem [shape: bf16[32,128], index: 3, kind: output, shape index: {}]  }
   0x1   :  { %v423_v0 = vld [vmem:[%s550_s1 + $0x40] sm:$0xff]   ;;  %v425_v2 = vld [vmem:[%s550_s1 + $0x48] sm:$0xff]   ;;  %v427_v4 = vld [vmem:[%s550_s1 + $0x50] sm:$0xff]  }
   0x2   :  { %v424_v1 = vld [vmem:[%s550_s1] sm:$0xff]   ;;  %383 = vmatprep.subr.bf16.mxu0 %v423_v0  ;;  %v426_v3 = vld [vmem:[%s550_s1 + $0x8] sm:$0xff]   ;;  %v428_v5 = vld [vmem:[%s550_s1 + $0x10] sm:$0xff]  }
   0x3   :  { %384 = vmatpush3.bf16.msra.mxu0 %v424_v1  ;;  %v429_v6 = vld [vmem:[%s550_s1 + $0x58] sm:$0xff]   ;;  %v431_v8 = vld [vmem:[%s550_s1 + $0x60] sm:$0xff]   ;;  %v433_v11 = vld [vmem:[%s550_s1 + $0x68] sm:$0xff]  }
   0x4   :  { %385 = vmatprep.subr.bf16.mxu0 %v425_v2  ;;  %v430_v7 = vld [vmem:[%s550_s1 + $0x18] sm:$0xff]   ;;  %v432_v9 = vld [vmem:[%s550_s1 + $0x20] sm:$0xff]   ;;  %v434_v12 = vld [vmem:[%s550_s1 + $0x28] sm:$0xff]  }
   0x5   :  { %v438_v10 = vld [vmem:[%s550_s1 + $0x80] sm:$0xff]   ;;  %v435_v13 = vld [vmem:[%s550_s1 + $0x70] sm:$0xff]   ;;  %v443_v15 = vld [vmem:[%s550_s1 + $0x88] sm:$0xff]  }
   0x6   :  { %415 = vmatprep.subr.bf16.mxu1 %v438_v10  ;;  %v442_v14 = vld [vmem:[%s551_s0 + $0x4] ss:$12 sps:$4 sm:$0xff]   ;;  %v444_v16 = vld [vmem:[%s551_s0 + $0x8] ss:$12 sps:$4 sm:$0xff]   ;;  %v445_v17 = vld [vmem:[%s551_s0 + $0x20] ss:$12 sps:$4 sm:$0xff]  }
   0x7   :  { %386 = vmatpush3.bf16.msra.mxu0 %v426_v3  ;;  %416 = vmatpush3.bf16.msra.mxu1 %v438_v10  ;;  %v436_v18 = vld [vmem:[%s550_s1 + $0x30] sm:$0xff]   ;;  %v437_v19 = vld [vmem:[%s550_s1 + $0x78] sm:$0xff]   ;;  %v440_v21 = vld [vmem:[%s551_s0] ss:$12 sps:$4 sm:$0xff]  }
   0x8   :  { %387 = vmatprep.subr.bf16.mxu0 %v427_v4  ;;  %243 = vmatprep.mubr.bf16.mxu0 %v442_v14  ;;  %v439_v20 = vld [vmem:[%s550_s1 + $0x38] sm:$0xff]   ;;  %v337_v30 = vld [vmem:[%s552_s2] ss:$0 sm:$0xff] }
   0x9   :  { %417 = vmatprep.subr.bf16.mxu1 %v443_v15  ;;  %419 = vmatprep.mubr.msk.bf16.mxu1 %vm204_vm0, %v444_v16  ;;  %v446_v22 = vld [vmem:[%s551_s0 + $0x1c] ss:$12 sps:$4 sm:$0xff]   ;;  %v448_v23 = vld [vmem:[%s551_s0 + $0x18] ss:$12 sps:$4 sm:$0xff]  }
   0xb   :  { %388 = vmatpush3.bf16.msra.mxu0 %v428_v5  ;;  %418 = vmatpush3.bf16.msra.mxu1 %v443_v15 }
   0xc   :  { %389 = vmatprep.subr.bf16.mxu0 %v429_v6 }
   0xe   :  { %420 = vmatmul.mubr.msk.bf16.vlgmr.msra.gmra.mrb[0].mxu1 %vm204_vm0, %v445_v17 }
   0xf   :  { %390 = vmatpush3.bf16.msra.mxu0 %v430_v7 }
  0x10   :  { %391 = vmatprep.subr.bf16.mxu0 %v431_v8 }
  0x13   :  { %392 = vmatpush3.bf16.msra.mxu0 %v432_v9 }
  0x14   :  { %393 = vmatprep.subr.bf16.mxu0 %v433_v11 }
  0x17   :  { %394 = vmatpush3.bf16.msra.mxu0 %v434_v12 }
  0x18   :  { %395 = vmatprep.subr.bf16.mxu0 %v435_v13 }
  0x1b   :  { %396 = vmatpush3.bf16.msra.mxu0 %v436_v18 }
  0x1c   :  { %397 = vmatprep.subr.bf16.mxu0 %v437_v19 }
  0x1f   :  { %398 = vmatpush3.bf16.msra.mxu0 %v439_v20 }
  0x22   :  { %244 = vmatmul.mubr.bf16.vlgmr.msra.gmra.mrb[0].mxu0 %v440_v21 }
  0x23   :  { %251 = vmatprep.mubr.bf16.mxu0 %v446_v22 }
  0x2a   :  { %252 = vmatmul.mubr.bf16.gmra.mrb[4].mxu0 %v448_v23 }
  0xe1   :  { %v421_v24 = vpop.f32.mrb[0].mxu1 }
  0xe2   :  { %v294_v25 = vpop.f32.mrb[1].mxu1 }
  0xe3   :  { %v422_v26 = vpop.f32.mrb[2].mxu1 }
  0xe4   :  { %v297_v27 = vpop.f32.mrb[3].mxu1 }
  0xf5   :  { %v399_v28 = vpop.f32.mrb[0].mxu0 }
  0xf6   :  { %v400_v29 = vpop.f32.mrb[1].mxu0 }
  0xf7   :  { %v401_v31 = vadd.f32 %v400_v29, %v399_v28  ;;  %v402_v32 = vpop.f32.mrb[2].mxu0 }
  0xf8   :  { %v403_v33 = vpop.f32.mrb[3].mxu0 }
  0xf9   :  { %v404_v34 = vadd.f32 %v403_v33, %v402_v32  ;;  %v246_v35 = vadd.f32 %v401_v31, %v337_v30 }
  0xfb   :  { %v295_v36 = vadd.f32 %v294_v25, %v246_v35  ;;  %v249_v37 = vadd.f32 %v404_v34, %v337_v30 }
  0xfd   :  { %v298_v38 = vadd.f32 %v297_v27, %v249_v37  ;;  %v405_v39 = vpop.f32.mrb[4].mxu0  ;;  %v309_v41 = vmax.f32 %v295_v36, 0.0 }
  0xfe   :  { %v406_v40 = vpop.f32.mrb[5].mxu0 }
  0xff   :  { %v310_v42 = vmax.f32 %v298_v38, 0.0  ;;  %v407_v43 = vadd.f32 %v406_v40, %v405_v39  ;;  %v408_v44 = vpop.f32.mrb[6].mxu0 }
 0x100   :  { %v409_v45 = vpop.f32.mrb[7].mxu0 }
 0x101   :  { %v375_v46 = vpack.c.bf16 %v310_v42, %v309_v41  ;;  %v254_v47 = vadd.f32 %v407_v43, %v337_v30  ;;  %v410_v48 = vadd.f32 %v409_v45, %v408_v44 }
 0x103   :  { %376 = vst [vmem:[%s553_s3] sm:$0xff] %v375_v46   ;;  %v303_v49 = vadd.f32 %v421_v24, %v254_v47  ;;  %v257_v50 = vadd.f32 %v410_v48, %v337_v30 }
 0x105   :  { %v306_v51 = vadd.f32 %v422_v26, %v257_v50  ;;  %v311_v52 = vmax.f32 %v303_v49, 0.0 }
 0x107   :  { %v312_v53 = vmax.f32 %v306_v51, 0.0 }
 0x109   :  { %v380_v54 = vpack.c.bf16 %v312_v53, %v311_v52 }
 0x10b   :  { %382 = vst [vmem:[%s553_s3 + $0x8] sm:$0xff] %v380_v54  }

// kernel: timm_sed_forward.5
= control target key start
LH: loop header
LB: loop body
LE: loop exit
PB: predicated region body
PF: predicated region fallthrough
CT: control target
= control target key end

     0   :  { %20 = vsyncpa [#allocation3], 0  ;;  %v1004_v2 = vmov 0   ;;  %v1005_v8 = vmov 0.0   ;;  %vm1006_vm0 = vmmov 0   ;;  %s1255_s0 = inlined_call_operand.vmem [shape: f32[8,128], index: 0, kind: input, shape index: {}]   ;;  %s1256_s1 = inlined_call_operand.vmem [shape: f32[8,1], index: 1, kind: input, shape index: {}]   ;;  %s1257_s2 = inlined_call_operand.vmem [shape: f32[8,1], index: 2, kind: input, shape index: {}]   ;;  %s1258_s3 = inlined_call_operand.vmem [shape: f32[8,2], index: 3, kind: input, shape index: {}]   ;;  %s1259_s4 = inlined_call_operand.vmem [shape: f32[2,8], index: 4, kind: input, shape index: {}]   ;;  %s1260_s5 = inlined_call_operand.vmem [shape: bf16[128,128], index: 5, kind: input, shape index: {}]   ;;  %s1261_s6 = inlined_call_operand.vmem [shape: f32[1,128], index: 6, kind: input, shape index: {}]   ;;  %s1262_s7 = inlined_call_operand.vmem [shape: bf16[128,128], index: 7, kind: input, shape index: {}]   ;;  %s1263_s8 = inlined_call_operand.vmem [shape: f32[1,128], index: 8, kind: input, shape index: {}]   ;;  %s1264_s9 = inlined_call_operand.vmem [shape: bf16[128,128], index: 9, kind: input, shape index: {}]   ;;  %s1265_s10 = inlined_call_operand.vmem [shape: f32[1,128], index: 10, kind: input, shape index: {}]   ;;  %s1266_s11 = inlined_call_operand.hbm [shape: f32[2,128], index: 11, kind: output, shape index: {0}]   ;;  %s1267_s12 = inlined_call_operand.hbm [shape: f32[2,128], index: 12, kind: output, shape index: {1}]   ;;  %s1268_s13 = inlined_call_operand.vmem [shape: f32[8,128], index: 13, kind: output, shape index: {2}]   ;;  %s1269_s14 = inlined_call_operand.vmem [shape: f32[8,128], index: 14, kind: output, shape index: {3}]  }
   0x1   :  { %v49_v0 = vld [vmem:[%s1257_s2] sm:$0xff]  ;;  %921 = vset.pattern.permute.xlu1 %v1004_v2  ;;  %920 = vset.pattern.permute.xlu0 %v1004_v2  ;;  %v923_v9 = vld [vmem:[%s1260_s5 + $0x8] sm:$0xff]   ;;  %v924_v10 = vld [vmem:[%s1260_s5 + $0x10] sm:$0xff]  }
   0x2   :  { %v48_v1 = vld [vmem:[%s1256_s1] sm:$0xff]  ;;  %v70_v3 = vsub.f32 1.0, %v49_v0  ;;  %66 = vperm.xlu1 %921, %v49_v0   ;;  %835 = vmatprep.subr.bf16.mxu0 %v1005_v8  ;;  %v925_v11 = vld [vmem:[%s1260_s5 + $0x18] sm:$0xff]   ;;  %v927_v14 = vld [vmem:[%s1260_s5 + $0x28] sm:$0xff]  }
   0x3   :  { %v56_v4 = vsub.f32 1.0, %v48_v1  ;;  %v922_v5 = vld [vmem:[%s1260_s5] sm:$0xff]   ;;  %52 = vperm.xlu0 %920, %v48_v1   ;;  %855 = vmatprep.subr.bf16.mxu1 %v1005_v8  ;;  %v932_v15 = vld [vmem:[%s1262_s7 + $0x8] sm:$0xff]  }
   0x4   :  { %v71_v6 = vmul.f32 -1e+30, %v70_v3  ;;  %836 = vmatpush3.bf16.msra.mxu0 %v922_v5  ;;  %851 = vmatprep.mubr.msk.bf16.mxu0 %vm1006_vm0, %v1005_v8  ;;  %v926_v12 = vld [vmem:[%s1260_s5 + $0x20] sm:$0xff]  }
   0x5   :  { %v57_v7 = vmul.f32 -1e+30, %v56_v4  ;;  %837 = vmatprep.subr.bf16.mxu0 %v1005_v8  ;;  %871 = vmatprep.mubr.msk.bf16.mxu1 %vm1006_vm0, %v1005_v8  ;;  %v930_v13 = vld [vmem:[%s1262_s7] sm:$0xff]  }
   0x6   :  { %74 = vperm.xlu1 %921, %v71_v6   ;;  %856 = vmatpush3.bf16.msra.mxu1 %v930_v13 }
   0x7   :  { %60 = vperm.xlu0 %920, %v57_v7   ;;  %857 = vmatprep.subr.bf16.mxu1 %v1005_v8 }
   0x8   :  { %838 = vmatpush3.bf16.msra.mxu0 %v923_v9 }
   0x9   :  { %839 = vmatprep.subr.bf16.mxu0 %v1005_v8 }
   0xc   :  { %840 = vmatpush3.bf16.msra.mxu0 %v924_v10 }
   0xd   :  { %841 = vmatprep.subr.bf16.mxu0 %v1005_v8 }
  0x10   :  { %842 = vmatpush3.bf16.msra.mxu0 %v925_v11 }
  0x11   :  { %843 = vmatprep.subr.bf16.mxu0 %v1005_v8 }
  0x14   :  { %844 = vmatpush3.bf16.msra.mxu0 %v926_v12 }
  0x15   :  { %845 = vmatprep.subr.bf16.mxu0 %v1005_v8 }
  0x16   :  { %21 = vsyncpa [#allocation5], 0  ;;  %858 = vmatpush3.bf16.msra.mxu1 %v932_v15  ;;  %v934_v16 = vld [vmem:[%s1262_s7 + $0x10] sm:$0xff]   ;;  %v936_v18 = vld [vmem:[%s1262_s7 + $0x18] sm:$0xff]   ;;  %vm425_vm1 = vcmask 64512   ;;  %vm503_vm2 = vcmask 1041408  }
  0x17   :  { %859 = vmatprep.subr.bf16.mxu1 %v1005_v8  ;;  %v928_v17 = vld [vmem:[%s1260_s5 + $0x30] sm:$0xff]   ;;  %v929_v19 = vld [vmem:[%s1260_s5 + $0x38] sm:$0xff]   ;;  %v938_v20 = vld [vmem:[%s1262_s7 + $0x20] sm:$0xff]   ;;  %vm499_vm3 = vcmask 15360  }
  0x18   :  { %846 = vmatpush3.bf16.msra.mxu0 %v927_v14  ;;  %v940_v21 = vld [vmem:[%s1262_s7 + $0x28] sm:$0xff]   ;;  %v45_v22 = vld [vmem:[%s1255_s0] sm:$0xff]  ;;  %v935_v42 = vld [vmem:[%s1264_s9 + $0x10] sm:$0xff]  }
  0x19   :  { %847 = vmatprep.subr.bf16.mxu0 %v1005_v8  ;;  %v47_v23 = vrot.slane %v45_v22, 1  ;;  %v46_v24 = vrot.slane %v45_v22, 7  ;;  %v931_v39 = vld [vmem:[%s1264_s9] sm:$0xff]   ;;  %v933_v41 = vld [vmem:[%s1264_s9 + $0x8] sm:$0xff]   ;;  %v937_v43 = vld [vmem:[%s1264_s9 + $0x18] sm:$0xff]  }
  0x1a   :  { %860 = vmatpush3.bf16.msra.mxu1 %v934_v16  ;;  %v939_v44 = vld [vmem:[%s1264_s9 + $0x20] sm:$0xff]   ;;  %v941_v45 = vld [vmem:[%s1264_s9 + $0x28] sm:$0xff]   ;;  %v942_v46 = vld [vmem:[%s1262_s7 + $0x30] sm:$0xff]  }
  0x1b   :  { %861 = vmatprep.subr.bf16.mxu1 %v1005_v8  ;;  %v943_v47 = vld [vmem:[%s1264_s9 + $0x30] sm:$0xff]   ;;  %v944_v48 = vld [vmem:[%s1262_s7 + $0x38] sm:$0xff]   ;;  %v767_v50 = vld [vmem:[%s1261_s6] ss:$0 sm:$0xff] }
  0x1c   :  { %848 = vmatpush3.bf16.msra.mxu0 %v928_v17  ;;  %v945_v49 = vld [vmem:[%s1264_s9 + $0x38] sm:$0xff]   ;;  %v776_v58 = vld [vmem:[%s1263_s8] ss:$0 sm:$0xff] }
  0x1d   :  { %849 = vmatprep.subr.bf16.mxu0 %v1005_v8  ;;  %v785_v59 = vld [vmem:[%s1265_s10] ss:$0 sm:$0xff] }
  0x1e   :  { %862 = vmatpush3.bf16.msra.mxu1 %v936_v18  ;;  %v424_v12 = vld [vmem:[%s1259_s4] sm:$0x3] }
  0x1f   :  { %863 = vmatprep.subr.bf16.mxu1 %v1005_v8  ;;  %v423_v15 = vld [vmem:[%s1258_s3] sm:$0xff]  ;;  %s1007_s3 = smov [#allocation2]  }
  0x20   :  { %850 = vmatpush3.bf16.msra.mxu0 %v929_v19  ;;  %s737_s4 = sshll.u32 %s1007_s3, 4  ;;  %s738_s4 = int_to_ptr.vmem [resolvable:$true] %s737_s4 }
  0x21   :  { %875 = vmatprep.subr.bf16.mxu0 %v1005_v8  ;;  %s956_s18 = scalar_lea.vmem %s738_s4, 32  ;;  %p961_p1 = scmp.lt.s32.totalorder %s738_s4, %s738_s4 }
  0x22   :  { %864 = vmatpush3.bf16.msra.mxu1 %v938_v20  ;;  %p957_p0 = scmp.ne.s32.totalorder %s738_s4, %s956_s18  ;;  %p962_p2 = scmp.lt.s32.totalorder %s956_s18, %s956_s18 }
  0x23   :  { %865 = vmatprep.subr.bf16.mxu1 %v1005_v8 }
  0x24   :  { %p963_p3 = por %p962_p2, %p961_p1 }
  0x26   :  { %866 = vmatpush3.bf16.msra.mxu1 %v940_v21  ;;  %p964_p4 = pnand %p963_p3, %p957_p0 }
  0x27   :  { %867 = vmatprep.subr.bf16.mxu1 %v1005_v8 }
  0x2a   :  { %868 = vmatpush3.bf16.msra.mxu1 %v942_v46 }
  0x2b   :  { %869 = vmatprep.subr.bf16.mxu1 %v1005_v8 }
  0x2e   :  { %870 = vmatpush3.bf16.msra.mxu1 %v944_v48 }
  0x2f   :  { %895 = vmatprep.subr.mxu1 %v1005_v8 }
  0x81   :  { %v67_v25 = vpop.permute.xlu1 %66 }
  0x82   :  { %v53_v26 = vpop.permute.xlu0 %52  ;;  %v69_v27 = vmul.f32 %v67_v25, %v47_v23 }
  0x83   :  { %v55_v28 = vmul.f32 %v53_v26, %v46_v24 }
  0x85   :  { %v80_v29 = vadd.f32 %v55_v28, %v45_v22  ;;  %v75_v30 = vpop.permute.xlu1 %74 }
  0x86   :  { %v61_v31 = vpop.permute.xlu0 %60  ;;  %v77_v34 = vadd.f32 %v75_v30, %v69_v27 }
  0x87   :  { %v81_v32 = vadd.f32 %v80_v29, %v69_v27  ;;  %v63_v33 = vadd.f32 %v61_v31, %v55_v28 }
  0x89   :  { %v78_v35 = vmax.f32 %v63_v33, %v45_v22  ;;  %v82_v36 = vmul.f32 0.33333334, %v81_v32 }
  0x8b   :  { %v79_v37 = vmax.f32 %v78_v35, %v77_v34 }
  0x8d   :  { %v83_v38 = vadd.f32 %v82_v36, %v79_v37 }
  0x8f   :  { %v84_v40 = vpack.c.bf16 %v83_v38, %v83_v38 }
  0x91   :  { %852 = vmatmul.mubr.bf16.vlgmr.msra.gmra.mrb[0].mxu0 %v84_v40 }
  0x92   :  { %876 = vmatpush3.bf16.msra.mxu0 %v931_v39  ;;  %891 = vmatprep.mubr.msk.bf16.mxu0 %vm1006_vm0, %v1005_v8 }
  0x93   :  { %877 = vmatprep.subr.bf16.mxu0 %v1005_v8 }
  0x96   :  { %878 = vmatpush3.bf16.msra.mxu0 %v933_v41 }
  0x97   :  { %879 = vmatprep.subr.bf16.mxu0 %v1005_v8 }
  0x9a   :  { %880 = vmatpush3.bf16.msra.mxu0 %v935_v42 }
  0x9b   :  { %881 = vmatprep.subr.bf16.mxu0 %v1005_v8 }
  0x9e   :  { %882 = vmatpush3.bf16.msra.mxu0 %v937_v43 }
  0x9f   :  { %883 = vmatprep.subr.bf16.mxu0 %v1005_v8 }
  0xa2   :  { %884 = vmatpush3.bf16.msra.mxu0 %v939_v44 }
  0xa3   :  { %885 = vmatprep.subr.bf16.mxu0 %v1005_v8 }
  0xa6   :  { %886 = vmatpush3.bf16.msra.mxu0 %v941_v45 }
  0xa7   :  { %887 = vmatprep.subr.bf16.mxu0 %v1005_v8 }
  0xaa   :  { %888 = vmatpush3.bf16.msra.mxu0 %v943_v47 }
  0xab   :  { %889 = vmatprep.subr.bf16.mxu0 %v1005_v8 }
  0xae   :  { %890 = vmatpush3.bf16.msra.mxu0 %v945_v49 }
 0x164   :  { %v190_v51 = vpop.f32.mrb[0].mxu0 }
 0x165   :  { %v191_v52 = vadd.f32 %v767_v50, %v190_v51  ;;  %v853_v53 = vpop.f32.mrb[1].mxu0 }
 0x166   :  { %v193_v54 = vpop.f32.mrb[2].mxu0 }
 0x167   :  { %v196_v55 = vmax.f32 %v191_v52, 0.0  ;;  %v854_v56 = vpop.f32.mrb[3].mxu0 }
 0x169   :  { %v197_v57 = vpack.c.bf16 %v196_v55, %v196_v55 }
 0x16b   :  { %872 = vmatmul.mubr.bf16.vlgmr.msra.gmra.mrb[0].mxu1 %v197_v57  ;;  %892 = vmatmul.mubr.bf16.vlgmr.msra.gmra.mrb[4].mxu0 %v197_v57 }
 0x16c   :  { %897 = vmatprep.mubr.msk.f32.mxu1 %vm1006_vm0, %v1005_v8 }
 0x23e   :  { %v303_v60 = vpop.f32.mrb[0].mxu1  ;;  %v414_v61 = vpop.f32.mrb[4].mxu0 }
 0x23f   :  { %v304_v62 = vadd.f32 %v776_v58, %v303_v60  ;;  %v415_v63 = vadd.f32 %v785_v59, %v414_v61  ;;  %v873_v0 = vpop.f32.mrb[1].mxu1  ;;  %v893_v1 = vpop.f32.mrb[5].mxu0 }
 0x240   :  { %v306_v2 = vpop.f32.mrb[2].mxu1  ;;  %v417_v3 = vpop.f32.mrb[6].mxu0 }
 0x241   :  { %946 = vtanh.f32 %v304_v62  ;;  %v797_v4 = vmul.f32 -1.442695, %v415_v63  ;;  %729 = vst [vmem:[%s1268_s13] sm:$0xff] %v415_v63  ;;  %v874_v5 = vpop.f32.mrb[3].mxu1  ;;  %v894_v6 = vpop.f32.mrb[7].mxu0 }
 0x243   :  { %948 = vpow2.f32 %v797_v4 }
 0x24b   :  { %v947_v7 = vpop.eup %946 }
 0x24c   :  { %v421_v9 = vmul.f32 1.442695, %v947_v7 }
 0x24d   :  { %v949_v10 = vpop.eup %948 }
 0x24e   :  { %950 = vpow2.f32 %v421_v9  ;;  %v582_v11 = vadd.f32 1.0, %v949_v10 }
 0x250   :  { %952 = vrcp.f32 %v582_v11 }
 0x258   :  { %v951_v13 = vpop.eup %950 }
 0x259   :  { %896 = vmatpush3.msra.mxu1 %v951_v13 }
 0x25a   :  { %v953_v14 = vpop.eup %952  ;;  %898 = vmatmul.mubr.msk.f32.vlgmr.msra.gmra.mrb[4].mxu1 %vm425_vm1, %v424_v12  ;;  %900 = vmatprep.subr.mxu1 %v1005_v8 }
 0x25b   :  { %730 = vst [vmem:[%s1269_s14] sm:$0xff] %v953_v14  ;;  %902 = vmatprep.mubr.msk.f32.mxu1 %vm1006_vm0, %v1005_v8  ;;  %s1008_s14 = smov [#allocation4]  }
 0x25c   :  { %s747_s17 = sshll.u32 %s1008_s14, 4  ;;  %s748_s17 = int_to_ptr.vmem [resolvable:$true] %s747_s17 }
 0x32d   :  { %v495_v16 = vpop.f32.mrb[4].mxu1 }
 0x32e   :  { %901 = vmatpush3.msk.msra.mxu1 %vm503_vm2, %v495_v16  ;;  %v899_v17 = vpop.f32.mrb[5].mxu1 }
 0x32f   :  { %903 = vmatmul.mubr.msk.f32.vlgmr.msra.gmra.mrb[6].mxu1 %vm499_vm3, %v423_v15  ;;  %905 = vmatprep.subr.mxu1 %v1005_v8 }
 0x330   :  { %907 = vmatprep.mubr.msk.f32.mxu1 %vm1006_vm0, %v1005_v8 }
 0x402   :  { %v573_v18 = vpop.f32.mrb[6].mxu1 }
 0x403   :  { %954 = vrcp.f32 %v573_v18  ;;  %v904_v19 = vpop.f32.mrb[7].mxu1 }
 0x40d   :  { %v955_v20 = vpop.eup %954 }
 0x40e   :  { %v578_v21 = vmul.f32 %v955_v20, %v951_v13 }
 0x410   :  { %v585_v22 = vmul.f32 %v953_v14, %v578_v21  ;;  %v657_v23 = vmul.f32 %v578_v21, %v415_v63 }
 0x412   :  { %906 = vmatpush3.msra.mxu1 %v585_v22 }
 0x413   :  { %910 = vmatprep.subr.mxu1 %v1005_v8  ;;  %908 = vmatmul.mubr.msk.f32.vlgmr.msra.gmra.mrb[8].mxu1 %vm425_vm1, %v424_v12 }
 0x414   :  { %911 = vmatpush3.msra.mxu1 %v657_v23  ;;  %912 = vmatprep.mubr.msk.f32.mxu1 %vm1006_vm0, %v1005_v8 }
 0x417   :  { %913 = vmatmul.mubr.msk.f32.vlgmr.msra.gmra.mrb[10].mxu1 %vm425_vm1, %v424_v12 }
 0x4e6   :  { %v652_v24 = vpop.f32.mrb[8].mxu1 }
 0x4e7   :  { %656 = vst [vmem:[#allocation2] sm:$0x3] %v652_v24  ;;  %v909_v25 = vpop.f32.mrb[9].mxu1 }
 0x4e8   :  { %967 = shalt.err (!%p964_p4)
}
 0x4e9   :  { %s968_s19 = scalar_lea.hbm %s1266_s11, 32 }
 0x4ea   :  { %p969_p5 = scmp.ne.s32.totalorder %s1266_s11, %s968_s19  ;;  %p972_p6 = scmp.lt.u32.totalorder %s968_s19, %s1266_s11 }
 0x4ec   :  { %p974_p7 = pnand %p972_p6, %p969_p5 }
 0x4ee   :  { %977 = shalt.err (!%p974_p7)
}
 0x4ef   :  { %740 = dma.vmem_to_hbm [thread:$0]  %s738_s4, 32, %s1266_s11, [#allocation3]   ;;  %v724_v8 = vpop.f32.mrb[10].mxu1 }
 0x4f0   :  { %728 = vst [vmem:[#allocation4] sm:$0x3] %v724_v8  ;;  %v914_v26 = vpop.f32.mrb[11].mxu1  ;;  %s978_s25 = scalar_lea.vmem %s748_s17, 32  ;;  %p983_p9 = scmp.lt.s32.totalorder %s748_s17, %s748_s17 }
 0x4f1   :  { %p979_p8 = scmp.ne.s32.totalorder %s748_s17, %s978_s25  ;;  %p984_p10 = scmp.lt.s32.totalorder %s978_s25, %s978_s25 }
 0x4f3   :  { %p985_p11 = por %p984_p10, %p983_p9 }
 0x4f5   :  { %p986_p12 = pnand %p985_p11, %p979_p8 }
 0x4f7   :  { %989 = shalt.err (!%p986_p12)
}
 0x4f8   :  { %s990_s7 = scalar_lea.hbm %s1267_s12, 32 }
 0x4f9   :  { %p991_p13 = scmp.ne.s32.totalorder %s1267_s12, %s990_s7  ;;  %p994_p0 = scmp.lt.u32.totalorder %s990_s7, %s1267_s12 }
 0x4fb   :  { %p996_p1 = pnand %p994_p0, %p991_p13 }
 0x4fd   :  { %999 = shalt.err (!%p996_p1)
}
 0x4fe   :  { %750 = dma.vmem_to_hbm [thread:$0]  %s748_s17, 32, %s1267_s12, [#allocation5]  }
 0x4ff   :  { %1000 = dma.done.wait [#allocation3], 32  }
 0x500   :  { %1001 = vsyncadd [#allocation3], 4294967264 }
 0x501   :  { %1002 = dma.done.wait [#allocation5], 32  }
 0x502   :  { %1003 = vsyncadd [#allocation5], 4294967264 }
 0x503   :  { %765 = vsyncpa [#allocation3], 1 }
 0x504   :  { %766 = vsyncpa [#allocation5], 1 }

</bundles_post_ra>
